<compile_context>
chip_gen: v7x
topology: tpu7x:2x2x1
jax: 0.10.0
libtpu: 0.0.40
codegen_flags: <defaults>
</compile_context>

<pallas_src>
import math
from functools import partial

import jax
import jax.numpy as jnp
import numpy as np
from jax.experimental import pallas as pl
from jax.experimental.pallas import tpu as pltpu


def _posenc_kernel(seed_ref, x_ref, pe_ref, o_ref, *, p, training):
    # Blocks are (ts, B*D): lane-dense, batch already folded into the lane axis.
    y = x_ref[...].astype(jnp.float32) + pe_ref[...].astype(jnp.float32)

    if training and p > 0.0:
        rows, lanes = y.shape
        # Counter-based PRNG: hash(global element index, seed) with a murmur3-style
        # finalizer.  Plain jnp integer ops only -> portable (Mosaic + interpret),
        # and blocks get decorrelated streams (no adjacent-integer seeding).
        r = jax.lax.broadcasted_iota(jnp.int32, y.shape, 0).astype(jnp.uint32)
        c = jax.lax.broadcasted_iota(jnp.int32, y.shape, 1).astype(jnp.uint32)
        base = (pl.program_id(0) * rows).astype(jnp.uint32)
        idx = (base + r) * jnp.uint32(lanes) + c
        h = idx + seed_ref[0].astype(jnp.uint32) * jnp.uint32(0x9E3779B1)
        h = h ^ (h >> 16)
        h = h * jnp.uint32(0x85EBCA6B)
        h = h ^ (h >> 13)
        h = h * jnp.uint32(0xC2B2AE35)
        h = h ^ (h >> 16)
        # Integer threshold compare: keep with probability (1 - p).
        thresh = jnp.uint32(min(int(round(p * 4294967296.0)), 4294967295))
        keep = h >= thresh
        y = jnp.where(keep, y * jnp.float32(1.0 / (1.0 - p)), jnp.float32(0.0))

    o_ref[...] = y.astype(o_ref.dtype)


def make_positional_encoding(max_len, d_model, dtype=jnp.float32):
    """Builds the same pe table as the PyTorch module's __init__: (max_len, d_model)."""
    position = jnp.arange(max_len, dtype=jnp.float32)[:, None]                    # (L, 1)
    div_term = jnp.exp(jnp.arange(0, d_model, 2, dtype=jnp.float32)
                       * (-math.log(10000.0) / d_model))                          # (D/2,)
    ang = position * div_term                                                     # (L, D/2)
    pe = jnp.zeros((max_len, d_model), jnp.float32)
    pe = pe.at[:, 0::2].set(jnp.sin(ang))
    pe = pe.at[:, 1::2].set(jnp.cos(ang))
    return pe.astype(dtype)


def prepare_pe_for_kernel(pe, batch, dtype=None):
    """One-time, register_buffer-style: tile pe across batch so the kernel sees a
    lane-dense (max_len, B*D) table whose lane order matches x.reshape(S, B*D)."""
    if dtype is not None:
        pe = pe.astype(dtype)
    return jnp.tile(pe, (1, batch))          # pe_lanes[s, b*D + d] == pe[s, d]


def _choose_block_rows(n_rows, row_bytes, target_block_bytes=4 << 20):
    """Seq-block height: a multiple of 8 sized for ~target_block_bytes per block
    (amortizes per-step overhead, stays well inside v7x's 64 MiB VMEM when
    double-buffered), capped so the grid has >=2 steps whenever n_rows allows
    (so v7x's second TensorCore gets a share of the HBM stream)."""
    if n_rows <= 8:
        return n_rows                                   # full-extent block: always legal
    rows = max(8, (target_block_bytes // max(row_bytes, 1)) // 8 * 8)
    two_step_cap = max(8, (n_rows // 2) // 8 * 8)
    return int(min(rows, two_step_cap))


def positional_encoding_forward(x, pe_lanes, *, p=0.1, training=False, seed=0):
    """x: (S, B, D), pe_lanes: (max_len, B*D)  ->  dropout(x + pe[:S]) of shape (S, B, D)."""
    S, B, D = x.shape
    BD = B * D
    assert pe_lanes.shape[0] >= S and pe_lanes.shape[1] == BD

    x2 = x.reshape(S, BD)                                # free row-major metadata reshape
    ts = _choose_block_rows(S, BD * x2.dtype.itemsize)
    grid = (pl.cdiv(S, ts),)
    seed_arr = jnp.array([seed], dtype=jnp.int32)

    kernel = partial(_posenc_kernel, p=float(p), training=bool(training))

    out2 = pl.pallas_call(
        kernel,
        out_shape=jax.ShapeDtypeStruct((S, BD), x.dtype),
        grid_spec=pltpu.PrefetchScalarGridSpec(
            num_scalar_prefetch=1,                       # seed lives in SMEM
            grid=grid,
            in_specs=[
                pl.BlockSpec((ts, BD), lambda s, seed_ref: (s, 0)),   # x block
                pl.BlockSpec((ts, BD), lambda s, seed_ref: (s, 0)),   # pe window (no per-call slice)
            ],
            out_specs=pl.BlockSpec((ts, BD), lambda s, seed_ref: (s, 0)),
        ),
        compiler_params=pltpu.CompilerParams(
            dimension_semantics=("parallel",),
            vmem_limit_bytes=48 * 1024 * 1024,
        ),
        # TODO(synk): callers that no longer need x can pass input_output_aliases={1: 0}
        # here to donate x's HBM buffer to the output (no bandwidth change, saves an alloc).
    )(seed_arr, x2, pe_lanes)

    return out2.reshape(S, B, D)


if __name__ == "__main__":
    SEQ, BATCH, D_MODEL, MAX_LEN, P = 8, 4, 32, 500, 0.1

    key = jax.random.PRNGKey(0)
    x = jax.random.normal(key, (SEQ, BATCH, D_MODEL), jnp.float32)

    # "Module init": build pe once and pre-tile it into its kernel-facing, lane-dense form.
    pe = make_positional_encoding(MAX_LEN, D_MODEL)
    pe_lanes = prepare_pe_for_kernel(pe, BATCH, dtype=x.dtype)   # (500, 128)

    # Eval mode (dropout = identity, like module.eval()): validate against pure JAX.
    out = positional_encoding_forward(x, pe_lanes, p=P, training=False)
    out = jax.block_until_ready(out)
    ref = x + pe[:SEQ][:, None, :]
    np.testing.assert_allclose(np.asarray(out), np.asarray(ref), rtol=1e-6, atol=1e-6)

    # Training mode: inverted dropout via the in-kernel counter-hash PRNG.  Every
    # surviving element equals (x + pe) / (1 - p); dropped elements are exactly 0.
    # TODO(synk): the dropout mask cannot be bit-identical to torch's RNG stream
    # (statistics and scaling do match).
    out_tr = positional_encoding_forward(x, pe_lanes, p=P, training=True, seed=1234)
    out_tr = jax.block_until_ready(out_tr)
    out_tr_np = np.asarray(out_tr)
    assert out_tr_np.shape == (SEQ, BATCH, D_MODEL)
    assert np.isfinite(out_tr_np).all()
    scaled_ref = np.asarray(ref) / (1.0 - P)
    nz = out_tr_np != 0.0
    np.testing.assert_allclose(out_tr_np[nz], scaled_ref[nz], rtol=1e-5, atol=1e-6)

    print("KERNEL_OK")
</pallas_src>

<mosaic_0001>
module attributes {stable_mosaic.version = 11 : i64} {
  func.func @_posenc_kernel(%arg0: i32, %arg1: memref<1xi32, #tpu.memory_space<smem>>, %arg2: memref<8x128xf32, #tpu.memory_space<vmem>>, %arg3: memref<8x128xf32, #tpu.memory_space<vmem>>, %arg4: memref<8x128xf32, #tpu.memory_space<vmem>>) attributes {dimension_semantics = [#tpu.dimension_semantics<parallel>], iteration_bounds = array<i64: 1>, scalar_prefetch = 1 : i64, scratch_operands = 0 : i64, tpu.core_type = #tpu.core_type<tc>, window_params = [{transform_indices = @transform_0, window_bounds = array<i64: 8, 128>}, {transform_indices = @transform_1, window_bounds = array<i64: 8, 128>}, {transform_indices = @transform_2, window_bounds = array<i64: 8, 128>}]} {
    %c0 = arith.constant 0 : index
    %c0_0 = arith.constant 0 : index
    %0 = vector.load %arg2[%c0, %c0_0] : memref<8x128xf32, #tpu.memory_space<vmem>>, vector<8x128xf32>
    %c0_1 = arith.constant 0 : index
    %c0_2 = arith.constant 0 : index
    %1 = vector.load %arg3[%c0_1, %c0_2] : memref<8x128xf32, #tpu.memory_space<vmem>>, vector<8x128xf32>
    %2 = arith.addf %0, %1 : vector<8x128xf32>
    %c0_3 = arith.constant 0 : index
    %c0_4 = arith.constant 0 : index
    %3 = vector.load %arg4[%c0_3, %c0_4] : memref<8x128xf32, #tpu.memory_space<vmem>>, vector<8x128xf32>
    tpu.vector_store %arg4[%c0_3, %c0_4], %2 {strides = array<i32>} : memref<8x128xf32, #tpu.memory_space<vmem>>, vector<8x128xf32>,
    return
  }
  func.func @transform_0(%arg0: i32, %arg1: memref<1xi32, #tpu.memory_space<smem>>) -> (i32, i32) {
    %c0_i32 = arith.constant 0 : i32
    %c0_i32_0 = arith.constant 0 : i32
    return %arg0, %c0_i32 : i32, i32
  }
  func.func @transform_1(%arg0: i32, %arg1: memref<1xi32, #tpu.memory_space<smem>>) -> (i32, i32) {
    %c0_i32 = arith.constant 0 : i32
    %c0_i32_0 = arith.constant 0 : i32
    return %arg0, %c0_i32 : i32, i32
  }
  func.func @transform_2(%arg0: i32, %arg1: memref<1xi32, #tpu.memory_space<smem>>) -> (i32, i32) {
    %c0_i32 = arith.constant 0 : i32
    %c0_i32_0 = arith.constant 0 : i32
    return %arg0, %c0_i32 : i32, i32
  }
}

</mosaic_0001>

<bundles_post_ra>
// kernel: tpu_custom_call.1
= control target key start
LH: loop header
LB: loop body
LE: loop exit
PB: predicated region body
PF: predicated region fallthrough
CT: control target
= control target key end

     0   :  { %9 = vsyncpa [#allocation5], 0  ;;  %s202_s0 = inlined_call_operand.<no memory space> [shape: s32[1], index: 0, kind: input, shape index: {}]   ;;  %s203_s1 = inlined_call_operand.hbm [shape: f32[8,128], index: 1, kind: input, shape index: {}]   ;;  %s204_s2 = inlined_call_operand.hbm [shape: f32[500,128], index: 2, kind: input, shape index: {}]   ;;  %s205_s3 = inlined_call_operand.hbm [shape: f32[8,128], index: 3, kind: output, shape index: {}]  }
   0x1   :  { %10 = vsyncpa [#allocation8], 0 }
   0x2   :  { %11 = vsyncpa [#allocation6], 0  ;;  %s133_s12 = smov [#allocation4]   ;;  %s134_s14 = smov [#allocation7]  }
   0x3   :  { %s18_s13 = sshll.u32 %s133_s12, 4  ;;  %s28_s15 = sshll.u32 %s134_s14, 4  ;;  %s19_s13 = int_to_ptr.vmem [resolvable:$true] %s18_s13  ;;  %s156_s15 = int_to_ptr.vmem [resolvable:$true] %s28_s15 }
   0x4   :  { %s61_s17 = scalar_lea.hbm %s203_s1, 128 }
   0x5   :  { %p62_p0 = scmp.ne.s32.totalorder %s203_s1, %s61_s17  ;;  %p65_p1 = scmp.lt.u32.totalorder %s61_s17, %s203_s1 }
   0x7   :  { %p67_p2 = pnand %p65_p1, %p62_p0 }
   0x9   :  { %70 = shalt.err (!%p67_p2)
}
   0xa   :  { %s71_s22 = scalar_lea.vmem %s19_s13, 128  ;;  %p76_p4 = scmp.lt.s32.totalorder %s19_s13, %s19_s13 }
   0xb   :  { %p72_p3 = scmp.ne.s32.totalorder %s19_s13, %s71_s22  ;;  %p77_p5 = scmp.lt.s32.totalorder %s71_s22, %s71_s22 }
   0xd   :  { %p78_p6 = por %p77_p5, %p76_p4 }
   0xf   :  { %p79_p7 = pnand %p78_p6, %p72_p3 }
  0x11   :  { %82 = shalt.err (!%p79_p7)
}
  0x12   :  { %21 = dma.hbm_to_vmem [thread:$0]  %s203_s1, 128, %s19_s13, [#allocation5]  }
  0x13   :  { %s83_s27 = scalar_lea.hbm %s204_s2, 128  ;;  %s85_s5 = scalar_lea.hbm %s204_s2, 8064 }
  0x14   :  { %p84_p8 = scmp.ne.s32.totalorder %s204_s2, %s83_s27  ;;  %p86_p9 = scmp.lt.u32.totalorder %s85_s5, %s83_s27 }
  0x15   :  { %p87_p10 = scmp.lt.u32.totalorder %s83_s27, %s204_s2 }
  0x17   :  { %p88_p11 = por %p87_p10, %p86_p9 }
  0x19   :  { %p89_p12 = pnand %p88_p11, %p84_p8 }
  0x1b   :  { %92 = shalt.err (!%p89_p12)
}
  0x1c   :  { %s93_s1 = scalar_lea.vmem %s156_s15, 128  ;;  %p98_p0 = scmp.lt.s32.totalorder %s156_s15, %s156_s15 }
  0x1d   :  { %p94_p13 = scmp.ne.s32.totalorder %s156_s15, %s93_s1  ;;  %p99_p1 = scmp.lt.s32.totalorder %s93_s1, %s93_s1 }
  0x1f   :  { %p100_p2 = por %p99_p1, %p98_p0 }
  0x21   :  { %p101_p3 = pnand %p100_p2, %p94_p13 }
  0x23   :  { %104 = shalt.err (!%p101_p3)
}
  0x24   :  { %31 = dma.hbm_to_vmem [thread:$0]  %s204_s2, 128, %s156_s15, [#allocation8]  }
  0x25   :  { %127 = dma.done.wait [#allocation5], 128  }
  0x26   :  { %128 = vsyncadd [#allocation5], 4294967168 }
  0x27   :  { %129 = dma.done.wait [#allocation8], 128  }
  0x28   :  { %130 = vsyncadd [#allocation8], 4294967168  ;;  %s135_s10 = smov [#allocation9]   ;;  %v38_v0 = vld [vmem:[#allocation4] sm:$0xff]  ;;  %v39_v1 = vld [vmem:[#allocation7] sm:$0xff] }
  0x29   :  { %s48_s11 = sshll.u32 %s135_s10, 4  ;;  %v40_v2 = vadd.f32 %v39_v1, %v38_v0  ;;  %s49_s11 = int_to_ptr.vmem [resolvable:$true] %s48_s11 }
  0x2a   :  { %s105_s12 = scalar_lea.vmem %s49_s11, 128  ;;  %p110_p5 = scmp.lt.s32.totalorder %s49_s11, %s49_s11 }
  0x2b   :  { %41 = vst [vmem:[#allocation9] sm:$0xff] %v40_v2  ;;  %p106_p4 = scmp.ne.s32.totalorder %s49_s11, %s105_s12  ;;  %p111_p6 = scmp.lt.s32.totalorder %s105_s12, %s105_s12 }
  0x2d   :  { %p112_p7 = por %p111_p6, %p110_p5 }
  0x2f   :  { %p113_p8 = pnand %p112_p7, %p106_p4 }
  0x31   :  { %116 = shalt.err (!%p113_p8)
}
  0x32   :  { %s117_s14 = scalar_lea.hbm %s205_s3, 128 }
  0x33   :  { %p118_p9 = scmp.ne.s32.totalorder %s205_s3, %s117_s14  ;;  %p121_p10 = scmp.lt.u32.totalorder %s117_s14, %s205_s3 }
  0x35   :  { %p123_p11 = pnand %p121_p10, %p118_p9 }
  0x37   :  { %126 = shalt.err (!%p123_p11)
}
  0x38   :  { %51 = dma.vmem_to_hbm [thread:$0]  %s49_s11, 128, %s205_s3, [#allocation6]  }
  0x39   :  { %131 = dma.done.wait [#allocation6], 128  }
  0x3a   :  { %132 = vsyncadd [#allocation6], 4294967168 }
  0x3b   :  { %55 = vsyncpa [#allocation5], 1 }
  0x3c   :  { %56 = vsyncpa [#allocation8], 1 }
  0x3d   :  { %57 = vsyncpa [#allocation6], 1 }

</bundles_post_ra>
